<compile_context>
chip_gen: v7x
topology: tpu7x:2x2x1
jax: 0.10.0
libtpu: 0.0.40
codegen_flags: <defaults>
</compile_context>

<pallas_src>
import functools

import jax
import jax.numpy as jnp
from jax.experimental import pallas as pl
from jax.experimental.pallas import tpu as pltpu


def _round_up(x, m):
    return ((x + m - 1) // m) * m


def _plv_pool_kernel_single(x_ref, bias_ref, o_ref, *, hw_total):
    # Whole spatial extent in one block: one native-dtype compare pass and a
    # single cross-lane reduce per row tile.
    gt = (x_ref[...] > bias_ref[...]).astype(jnp.float32)
    o_ref[...] = jnp.sum(gt, axis=-1, keepdims=True) * (1.0 / hw_total)


def _plv_pool_kernel_multi(x_ref, bias_ref, o_ref, acc_ref, *, hw_total, tk):
    # x_ref:    (TM, TK)   native dtype
    # bias_ref: (TM, 1)    native dtype (same as x -> packed compare on v6e/v7x)
    # o_ref:    (TM, 1)    f32
    # acc_ref:  (TM, 128)  f32 lane-wide running sum (VPU adds only per step)
    k = pl.program_id(1)
    nk = pl.num_programs(1)

    @pl.when(k == 0)
    def _():
        acc_ref[...] = jnp.zeros_like(acc_ref)

    def fold(g):
        # g: (TM, TK) f32 with TK % 128 == 0. Lane-aligned static slices fold
        # into a (TM, 128) partial with plain VPU adds — no per-step XLU reduce,
        # no narrow (lane-1) stores.
        part = g[:, 0:128]
        for j in range(1, tk // 128):
            part = part + g[:, j * 128:(j + 1) * 128]
        return part

    gt = (x_ref[...] > bias_ref[...]).astype(jnp.float32)

    if hw_total % tk != 0:
        # Ragged last HW block: masking (iota/compare/select) is gated so it is
        # only paid on the final k step, not every step.
        @pl.when(k == nk - 1)
        def _():
            col = jax.lax.broadcasted_iota(jnp.int32, gt.shape, 1) + k * tk
            acc_ref[...] += fold(jnp.where(col < hw_total, gt, 0.0))

        @pl.when(k != nk - 1)
        def _():
            acc_ref[...] += fold(gt)
    else:
        acc_ref[...] += fold(gt)

    @pl.when(k == nk - 1)
    def _():
        o_ref[...] = jnp.sum(acc_ref[...], axis=-1, keepdims=True) * (1.0 / hw_total)


def plv_pooling(x, bias, *, vmem_budget_bytes=None):
    """x: (B, C, H, W) (NCHW, any float dtype); bias: (C,).

    Returns (B, C, 1, 1) float32, matching the PyTorch module.
    """
    B, C, H, W = x.shape
    BC, HW = B * C, H * W

    # One HBM read of x in its native dtype; compare also happens in x.dtype.
    x2 = x.reshape(BC, HW)
    bias2 = jnp.tile(bias.astype(x.dtype), B).reshape(BC, 1)  # bias[c] per (b, c) row

    itemsize = jnp.dtype(x.dtype).itemsize

    # Generation-aware VMEM budget for the double-buffered (TM, TK) input tile:
    # ~3/8 of physical VMEM (128 MiB v5e/v6e -> 48 MiB; 64 MiB v7x -> 24 MiB).
    try:
        vmem_cap = int(pltpu.get_tpu_info().vmem_capacity_bytes)
    except Exception:
        vmem_cap = 64 * 1024 * 1024  # conservative default, fits every generation
    if vmem_budget_bytes is None:
        vmem_budget_bytes = (vmem_cap * 3) // 8
    vmem_limit_bytes = int(min((vmem_cap * 9) // 10, 100 * 1024 * 1024))

    # Row tile: multiple of 8; prefer growing TK over TM (fewer live lane
    # partials / less vreg pressure). Keep >= 2 row tiles when possible so the
    # "parallel" axis can shard across v7x's two TensorCores.
    TM = min(256, _round_up(BC, 8))
    if BC > 8 and pl.cdiv(BC, TM) < 2:
        TM = max(8, _round_up(pl.cdiv(BC, 2), 8))

    # Spatial tile: full HW if the double-buffered block fits the budget, else
    # the largest multiple of 128 that does.
    max_tk = max(128, vmem_budget_bytes // (2 * TM * itemsize))
    TK = HW if HW <= max_tk else (max_tk // 128) * 128
    nk = pl.cdiv(HW, TK)

    compiler_params = pltpu.CompilerParams(
        dimension_semantics=("parallel",) if nk == 1 else ("parallel", "arbitrary"),
        vmem_limit_bytes=vmem_limit_bytes,
    )

    # TODO(synk): output is a lane-width-1 column (masked vst); the lane-dense
    # (tiles, TM) output layout is left out since output bytes are negligible
    # vs. the single read of x here.
    if nk == 1:
        out2 = pl.pallas_call(
            functools.partial(_plv_pool_kernel_single, hw_total=HW),
            out_shape=jax.ShapeDtypeStruct((BC, 1), jnp.float32),
            grid_spec=pltpu.PrefetchScalarGridSpec(
                num_scalar_prefetch=0,
                grid=(pl.cdiv(BC, TM),),
                in_specs=[
                    pl.BlockSpec((TM, HW), lambda i: (i, 0)),
                    pl.BlockSpec((TM, 1), lambda i: (i, 0)),
                ],
                out_specs=pl.BlockSpec((TM, 1), lambda i: (i, 0)),
            ),
            compiler_params=compiler_params,
        )(x2, bias2)
    else:
        out2 = pl.pallas_call(
            functools.partial(_plv_pool_kernel_multi, hw_total=HW, tk=TK),
            out_shape=jax.ShapeDtypeStruct((BC, 1), jnp.float32),
            grid_spec=pltpu.PrefetchScalarGridSpec(
                num_scalar_prefetch=0,
                grid=(pl.cdiv(BC, TM), nk),
                in_specs=[
                    pl.BlockSpec((TM, TK), lambda i, k: (i, k)),
                    pl.BlockSpec((TM, 1), lambda i, k: (i, 0)),
                ],
                out_specs=pl.BlockSpec((TM, 1), lambda i, k: (i, 0)),
                scratch_shapes=[pltpu.VMEM((TM, 128), jnp.float32)],
            ),
            compiler_params=compiler_params,
        )(x2, bias2)

    return out2.reshape(B, C, 1, 1)


def _reference(x, bias):
    B, C, H, W = x.shape
    gt = (x > bias.reshape(1, C, 1, 1).astype(x.dtype)).astype(jnp.float32)
    return jnp.mean(gt, axis=(2, 3)).reshape(B, C, 1, 1)


if __name__ == "__main__":
    key = jax.random.PRNGKey(0)
    kx, kb = jax.random.split(key)

    B, C, H, W = 2, 4, 16, 16
    x = jax.random.normal(kx, (B, C, H, W), dtype=jnp.float32)
    # The PyTorch module takes bias as an input; shape (C,) so it can be viewed
    # as (C, 1, 1).
    bias = jax.random.normal(kb, (C,), dtype=jnp.float32) * 0.1

    out = plv_pooling(x, bias)
    out = jax.block_until_ready(out)

    ref = _reference(x, bias)
    assert out.shape == (B, C, 1, 1)
    assert jnp.allclose(out, ref, atol=1e-6), (out, ref)

    print("KERNEL_OK")
</pallas_src>

<mosaic_0001>
module attributes {stable_mosaic.version = 11 : i64} {
  func.func @_plv_pool_kernel_single(%arg0: i32, %arg1: memref<8x256xf32, #tpu.memory_space<vmem>>, %arg2: memref<8x1xf32, #tpu.memory_space<vmem>>, %arg3: memref<8x1xf32, #tpu.memory_space<vmem>>) attributes {dimension_semantics = [#tpu.dimension_semantics<parallel>], iteration_bounds = array<i64: 1>, scalar_prefetch = 0 : i64, scratch_operands = 0 : i64, tpu.core_type = #tpu.core_type<tc>, window_params = [{transform_indices = @transform_0, window_bounds = array<i64: 8, 256>}, {transform_indices = @transform_1, window_bounds = array<i64: 8, 1>}, {transform_indices = @transform_2, window_bounds = array<i64: 8, 1>}]} {
    %c0 = arith.constant 0 : index
    %c0_0 = arith.constant 0 : index
    %0 = vector.load %arg1[%c0, %c0_0] : memref<8x256xf32, #tpu.memory_space<vmem>>, vector<8x256xf32>
    %c0_1 = arith.constant 0 : index
    %c0_2 = arith.constant 0 : index
    %1 = vector.load %arg2[%c0_1, %c0_2] : memref<8x1xf32, #tpu.memory_space<vmem>>, vector<8x1xf32>
    %2 = vector.broadcast %1 : vector<8x1xf32> to vector<8x256xf32>
    %3 = arith.cmpf ogt, %0, %2 : vector<8x256xf32>
    %4 = arith.extui %3 : vector<8x256xi1> to vector<8x256xi32>
    %5 = arith.sitofp %4 : vector<8x256xi32> to vector<8x256xf32>
    %cst = arith.constant dense<0.000000e+00> : vector<8xf32>
    %6 = vector.multi_reduction <add>, %5, %cst [1] : vector<8x256xf32> to vector<8xf32>
    %7 = vector.shape_cast %6 : vector<8xf32> to vector<8x1xf32>
    %cst_3 = arith.constant 3.906250e-03 : f32
    %8 = vector.broadcast %cst_3 : f32 to vector<8x1xf32>
    %9 = arith.mulf %7, %8 : vector<8x1xf32>
    %c0_4 = arith.constant 0 : index
    %c0_5 = arith.constant 0 : index
    %10 = vector.load %arg3[%c0_4, %c0_5] : memref<8x1xf32, #tpu.memory_space<vmem>>, vector<8x1xf32>
    tpu.vector_store %arg3[%c0_4, %c0_5], %9 {strides = array<i32>} : memref<8x1xf32, #tpu.memory_space<vmem>>, vector<8x1xf32>,
    return
  }
  func.func @transform_0(%arg0: i32) -> (i32, i32) {
    %c0_i32 = arith.constant 0 : i32
    %c0_i32_0 = arith.constant 0 : i32
    return %arg0, %c0_i32 : i32, i32
  }
  func.func @transform_1(%arg0: i32) -> (i32, i32) {
    %c0_i32 = arith.constant 0 : i32
    %c0_i32_0 = arith.constant 0 : i32
    return %arg0, %c0_i32 : i32, i32
  }
  func.func @transform_2(%arg0: i32) -> (i32, i32) {
    %c0_i32 = arith.constant 0 : i32
    %c0_i32_0 = arith.constant 0 : i32
    return %arg0, %c0_i32 : i32, i32
  }
}

</mosaic_0001>

<bundles_post_ra>
// kernel: tpu_custom_call.1
= control target key start
LH: loop header
LB: loop body
LE: loop exit
PB: predicated region body
PF: predicated region fallthrough
CT: control target
= control target key end

     0   :  { %7 = vsyncpa [#allocation3], 0  ;;  %s78_s9 = smov [#allocation2]   ;;  %s114_s0 = inlined_call_operand.hbm [shape: f32[8,256], index: 0, kind: input, shape index: {}]   ;;  %s115_s1 = inlined_call_operand.vmem [shape: f32[8,1], index: 1, kind: input, shape index: {}]   ;;  %s116_s2 = inlined_call_operand.vmem [shape: f32[8,1], index: 2, kind: output, shape index: {}]  }
   0x1   :  { %s14_s10 = sshll.u32 %s78_s9, 4  ;;  %s54_s13 = scalar_lea.hbm %s114_s0, 256  ;;  %s15_s10 = int_to_ptr.vmem [resolvable:$true] %s14_s10 }
   0x2   :  { %p55_p0 = scmp.ne.s32.totalorder %s114_s0, %s54_s13  ;;  %p58_p1 = scmp.lt.u32.totalorder %s54_s13, %s114_s0 }
   0x4   :  { %p60_p2 = pnand %p58_p1, %p55_p0 }
   0x6   :  { %63 = shalt.err (!%p60_p2)
}
   0x7   :  { %s64_s18 = scalar_lea.vmem %s15_s10, 256  ;;  %p69_p4 = scmp.lt.s32.totalorder %s15_s10, %s15_s10 }
   0x8   :  { %p65_p3 = scmp.ne.s32.totalorder %s15_s10, %s64_s18  ;;  %p70_p5 = scmp.lt.s32.totalorder %s64_s18, %s64_s18 }
   0xa   :  { %p71_p6 = por %p70_p5, %p69_p4 }
   0xc   :  { %p72_p7 = pnand %p71_p6, %p65_p3 }
   0xe   :  { %75 = shalt.err (!%p72_p7)
}
   0xf   :  { %17 = dma.hbm_to_vmem [thread:$0]  %s114_s0, 256, %s15_s10, [#allocation3]  }
  0x10   :  { %76 = dma.done.wait [#allocation3], 256  }
  0x11   :  { %77 = vsyncadd [#allocation3], 4294967040  ;;  %v79_v0 = vmov 0   ;;  %v25_v1 = vld [vmem:[%s115_s1] sm:$0xff]  ;;  %v24_v3 = vld [vmem:[#allocation2 + $0x8] sm:$0xff]  ;;  %v80_v5 = vmov 0.0  }
  0x12   :  { %53 = vset.pattern.permute.xlu0 %v79_v0  ;;  %v23_v2 = vld [vmem:[#allocation2] sm:$0xff]  ;;  %vm41_vm2 = vcmask 7168  }
  0x13   :  { %28 = vperm.xlu0 %53, %v25_v1  }
  0x92   :  { %v29_v4 = vpop.permute.xlu0 %28 }
  0x93   :  { %vm31_vm0 = vcmp.gt.f32.partialorder %v23_v2, %v29_v4  ;;  %vm32_vm1 = vcmp.gt.f32.partialorder %v24_v3, %v29_v4 }
  0x94   :  { %v48_v6 = vsel %vm31_vm0, 1.0, %v80_v5  ;;  %v49_v7 = vsel %vm32_vm1, 1.0, %v80_v5 }
  0x95   :  { %v37_v8 = vadd.f32 %v49_v7, %v48_v6 }
  0x97   :  { %38 = vadd.xlane.f32.xlu0 %v37_v8 }
 0x124   :  { %v39_v9 = vpop.xlane.xlu0 %38 }
 0x125   :  { %v40_v10 = vmul.f32 0.00390625, %v39_v9 }
 0x127   :  { %42 = vst.msk [vmem:[%s116_s2] sm:$0xff] %vm41_vm2, %v40_v10 }
 0x128   :  { %47 = vsyncpa [#allocation3], 1 }

</bundles_post_ra>
